<compile_context>
chip_gen: v7x
topology: tpu7x:2x2x1
jax: 0.10.0
libtpu: 0.0.40
codegen_flags: <defaults>
</compile_context>

<pallas_src>
import jax
import jax.numpy as jnp
from jax import lax
from jax.experimental import pallas as pl
from jax.experimental.pallas import tpu as pltpu

LANE = 128
SUBLANE = 8
CHUNK_ROWS = 256          # per-iteration chunk inside the kernel (128 KiB f32)
MAX_ROW_TILE = 4096       # (4096, 128) f32 block = 2 MiB per input per buffer
VMEM_LIMIT_BYTES = 32 * 1024 * 1024


def _round_up(x, m):
    return (x + m - 1) // m * m


def _num_tensorcores():
    """TensorCores per chip (1 on v5e/v6e, 2 on v7x); conservative default 1."""
    try:
        info = pltpu.get_tpu_info()
        for attr in ("num_cores", "num_tensorcores", "tensorcore_count",
                     "num_tensor_cores", "cores_per_chip"):
            n = getattr(info, attr, None)
            if isinstance(n, int) and n >= 1:
                return min(n, 2)
    except Exception:
        pass
    try:
        kind = jax.devices()[0].device_kind.lower()
        if "7" in kind:           # v7x family: 2 TensorCores per chip
            return 2
    except Exception:
        pass
    return 1


def _make_kernel(chunk, n_chunks):
    def kernel(p_ref, t_ref, acc_ref):
        """Accumulate partial sums into a per-core resident (1, 32, 128) block.

        Sublane rows 0:8   -> sum(p * t)                (intersection)
        Sublane rows 8:16  -> sum(p)
        Sublane rows 16:24 -> sum(t)
        Sublane rows 24:32 -> sum(t*log p + (1-t)*log(1-p))   (un-negated BCE)
        """
        step = pl.program_id(1)

        @pl.when(step == 0)
        def _():
            acc_ref[...] = jnp.zeros_like(acc_ref)

        def fold(x):
            # (chunk, 128) -> (8, 128) via sublane-aligned vreg adds; the
            # expensive cross-lane reduce stays in the tiny wrapper epilogue.
            return jnp.sum(x.reshape(-1, SUBLANE, LANE), axis=0)

        def body(c, carry):
            a_pt, a_p, a_t, a_bce = carry
            r = pl.multiple_of(c * chunk, chunk)
            p = p_ref[0, pl.ds(r, chunk), :].astype(jnp.float32)
            t = t_ref[0, pl.ds(r, chunk), :].astype(jnp.float32)
            # nn.BCELoss: clamp each log at -100 BEFORE multiplying (no 0*-inf).
            log_p = jnp.maximum(jnp.log(p), -100.0)
            log_1mp = jnp.maximum(jnp.log(1.0 - p), -100.0)
            bce_pos = log_1mp + t * (log_p - log_1mp)   # negated once, in wrapper
            return (a_pt + fold(p * t), a_p + fold(p),
                    a_t + fold(t), a_bce + fold(bce_pos))

        init = tuple(jnp.zeros((SUBLANE, LANE), jnp.float32) for _ in range(4))
        a_pt, a_p, a_t, a_bce = lax.fori_loop(
            0, n_chunks, body, init, unroll=min(n_chunks, 2))

        acc_ref[0, 0:8, :] += a_pt
        acc_ref[0, 8:16, :] += a_p
        acc_ref[0, 16:24, :] += a_t
        acc_ref[0, 24:32, :] += a_bce

    return kernel


def dice_bce_loss(net_output, target, weight_ce=0.6, smooth=1e-5):
    """0.6 * BCE(net_output, target) + 0.4 * DiceLoss(net_output, target)."""
    total = net_output.size
    p_flat = net_output.reshape(-1)
    t_flat = target.reshape(-1)

    num_cores = _num_tensorcores()

    # Tiling: 128-lane rows, split across detected cores, <=4096-row tiles,
    # row_tile a multiple of the in-kernel chunk.
    rows = -(-total // LANE)
    rows_per_core = -(-rows // num_cores)
    row_tile = min(MAX_ROW_TILE, _round_up(max(rows_per_core, 1), SUBLANE))
    chunk = min(CHUNK_ROWS, row_tile)
    row_tile = _round_up(row_tile, chunk)
    n_chunks = row_tile // chunk
    steps = -(-rows_per_core // row_tile)
    rows_per_core = steps * row_tile
    padded_total = num_cores * rows_per_core * LANE

    pad = padded_total - total
    if pad:
        # p = t = 0 padding contributes exactly 0 to all four partial sums;
        # the BCE mean below divides by the true element count.
        p_flat = jnp.pad(p_flat, (0, pad))
        t_flat = jnp.pad(t_flat, (0, pad))

    # Keep native dtype (bf16 callers halve HBM traffic); the kernel upcasts.
    p3 = p_flat.reshape(num_cores, rows_per_core, LANE)
    t3 = t_flat.reshape(num_cores, rows_per_core, LANE)

    kernel = _make_kernel(chunk, n_chunks)

    def run(dim_sems):
        return pl.pallas_call(
            kernel,
            out_shape=jax.ShapeDtypeStruct((num_cores, 4 * SUBLANE, LANE),
                                           jnp.float32),
            grid=(num_cores, steps),
            in_specs=[
                pl.BlockSpec((1, row_tile, LANE), lambda c, i: (c, i, 0)),
                pl.BlockSpec((1, row_tile, LANE), lambda c, i: (c, i, 0)),
            ],
            # Output block index constant along the reduction axis -> the block
            # stays VMEM-resident and acts as the accumulator (one per core).
            out_specs=pl.BlockSpec((1, 4 * SUBLANE, LANE), lambda c, i: (c, 0, 0)),
            compiler_params=pltpu.CompilerParams(
                dimension_semantics=dim_sems,
                vmem_limit_bytes=VMEM_LIMIT_BYTES,
            ),
        )(p3, t3)

    if num_cores > 1:
        core_sem = getattr(pltpu, "CORE_PARALLEL", "parallel")
        arb_sem = getattr(pltpu, "ARBITRARY", "arbitrary")
        try:
            partials = run((core_sem, arb_sem))
        except Exception:
            # Fallback if CORE_PARALLEL lowering is rejected on this target.
            partials = run(("parallel", "arbitrary"))
    else:
        partials = run(("arbitrary", "arbitrary"))

    # Epilogue on <=8 KiB of partials: cross-core + cross-lane reduce + scalars.
    per_core = partials.reshape(num_cores, 4, SUBLANE, LANE)
    sums = jnp.sum(per_core, axis=(0, 2, 3))                  # (4,)
    inter, sum_p, sum_t, bce_pos_sum = sums[0], sums[1], sums[2], sums[3]

    dice_score = (2.0 * inter + smooth) / (sum_p + sum_t + smooth)
    dc_loss = 1.0 - dice_score
    ce_loss = -bce_pos_sum / float(total)        # single negation; BCELoss mean
    return weight_ce * ce_loss + (1.0 - weight_ce) * dc_loss


if __name__ == "__main__":
    key = jax.random.PRNGKey(0)
    k1, k2 = jax.random.split(key)

    N, C, H, W = 2, 4, 16, 16                      # NCHW, matching PyTorch convention
    logits = jax.random.normal(k1, (N, C, H, W), dtype=jnp.float32)
    net_output = jax.nn.sigmoid(logits)            # probabilities in (0, 1) for BCE
    target = jax.random.bernoulli(k2, p=0.5, shape=(N, C, H, W)).astype(jnp.float32)

    loss = dice_bce_loss(net_output, target)
    jax.block_until_ready(loss)

    # Reference check in plain JAX (same semantics as the PyTorch module).
    p = net_output.reshape(-1)
    t = target.reshape(-1)
    inter = jnp.sum(p * t)
    dice = 1.0 - (2.0 * inter + 1e-5) / (jnp.sum(p) + jnp.sum(t) + 1e-5)
    bce = jnp.mean(-(t * jnp.maximum(jnp.log(p), -100.0)
                     + (1.0 - t) * jnp.maximum(jnp.log(1.0 - p), -100.0)))
    ref = 0.6 * bce + 0.4 * dice
    assert jnp.allclose(loss, ref, rtol=1e-5, atol=1e-5), (loss, ref)

    print("KERNEL_OK")
</pallas_src>

<mosaic_0001>
module attributes {stable_mosaic.version = 11 : i64} {
  func.func @kernel(%arg0: i32, %arg1: i32, %arg2: memref<1x16x128xf32, #tpu.memory_space<vmem>>, %arg3: memref<1x16x128xf32, #tpu.memory_space<vmem>>, %arg4: memref<1x32x128xf32, #tpu.memory_space<vmem>>) attributes {dimension_semantics = [#tpu.dimension_semantics<arbitrary>, #tpu.dimension_semantics<arbitrary>], iteration_bounds = array<i64: 1, 1>, scalar_prefetch = 0 : i64, scratch_operands = 0 : i64, tpu.core_type = #tpu.core_type<tc>, window_params = [{transform_indices = @transform_0, window_bounds = array<i64: 1, 16, 128>}, {transform_indices = @transform_1, window_bounds = array<i64: 1, 16, 128>}, {transform_indices = @transform_2, window_bounds = array<i64: 1, 32, 128>}]} {
    %c0_i32 = arith.constant 0 : i32
    %0 = arith.cmpi eq, %arg1, %c0_i32 : i32
    %1 = arith.extui %0 : i1 to i32
    %c0_i32_0 = arith.constant 0 : i32
    %2 = arith.cmpi ne, %1, %c0_i32_0 : i32
    scf.if %2 {
      %cst_36 = arith.constant 0.000000e+00 : f32
      %63 = vector.broadcast %cst_36 : f32 to vector<1x32x128xf32>
      %c0_37 = arith.constant 0 : index
      %c0_38 = arith.constant 0 : index
      %c0_39 = arith.constant 0 : index
      %64 = vector.load %arg4[%c0_37, %c0_38, %c0_39] : memref<1x32x128xf32, #tpu.memory_space<vmem>>, vector<1x32x128xf32>
      tpu.vector_store %arg4[%c0_37, %c0_38, %c0_39], %63 {strides = array<i32>} : memref<1x32x128xf32, #tpu.memory_space<vmem>>, vector<1x32x128xf32>,
    } else {
    }
    %cst = arith.constant 0.000000e+00 : f32
    %3 = vector.broadcast %cst : f32 to vector<8x128xf32>
    %cst_1 = arith.constant 0.000000e+00 : f32
    %4 = vector.broadcast %cst_1 : f32 to vector<8x128xf32>
    %cst_2 = arith.constant 0.000000e+00 : f32
    %5 = vector.broadcast %cst_2 : f32 to vector<8x128xf32>
    %cst_3 = arith.constant 0.000000e+00 : f32
    %6 = vector.broadcast %cst_3 : f32 to vector<8x128xf32>
    %c0_i32_4 = arith.constant 0 : i32
    %c16_i32 = arith.constant 16 : i32
    %7 = arith.muli %c0_i32_4, %c16_i32 : i32
    %8 = tpu.assume_multiple %7, 16 : i32
    %c0 = arith.constant 0 : index
    %9 = arith.index_cast %8 : i32 to index
    %c0_5 = arith.constant 0 : index
    %10 = vector.load %arg2[%c0, %9, %c0_5] : memref<1x16x128xf32, #tpu.memory_space<vmem>>, vector<1x16x128xf32>
    %11 = vector.shape_cast %10 : vector<1x16x128xf32> to vector<16x128xf32>
    %c0_6 = arith.constant 0 : index
    %12 = arith.index_cast %8 : i32 to index
    %c0_7 = arith.constant 0 : index
    %13 = vector.load %arg3[%c0_6, %12, %c0_7] : memref<1x16x128xf32, #tpu.memory_space<vmem>>, vector<1x16x128xf32>
    %14 = vector.shape_cast %13 : vector<1x16x128xf32> to vector<16x128xf32>
    %15 = math.log %11 : vector<16x128xf32>
    %cst_8 = arith.constant -1.000000e+02 : f32
    %16 = vector.broadcast %cst_8 : f32 to vector<16x128xf32>
    %17 = arith.maximumf %15, %16 : vector<16x128xf32>
    %cst_9 = arith.constant 1.000000e+00 : f32
    %18 = vector.broadcast %cst_9 : f32 to vector<16x128xf32>
    %19 = arith.subf %18, %11 : vector<16x128xf32>
    %20 = math.log %19 : vector<16x128xf32>
    %cst_10 = arith.constant -1.000000e+02 : f32
    %21 = vector.broadcast %cst_10 : f32 to vector<16x128xf32>
    %22 = arith.maximumf %20, %21 : vector<16x128xf32>
    %23 = arith.subf %17, %22 : vector<16x128xf32>
    %24 = arith.mulf %14, %23 : vector<16x128xf32>
    %25 = arith.addf %22, %24 : vector<16x128xf32>
    %26 = arith.mulf %11, %14 : vector<16x128xf32>
    %27 = vector.shape_cast %26 : vector<16x128xf32> to vector<2x8x128xf32>
    %cst_11 = arith.constant dense<0.000000e+00> : vector<8x128xf32>
    %28 = vector.multi_reduction <add>, %27, %cst_11 [0] : vector<2x8x128xf32> to vector<8x128xf32>
    %29 = arith.addf %3, %28 : vector<8x128xf32>
    %30 = vector.shape_cast %11 : vector<16x128xf32> to vector<2x8x128xf32>
    %cst_12 = arith.constant dense<0.000000e+00> : vector<8x128xf32>
    %31 = vector.multi_reduction <add>, %30, %cst_12 [0] : vector<2x8x128xf32> to vector<8x128xf32>
    %32 = arith.addf %4, %31 : vector<8x128xf32>
    %33 = vector.shape_cast %14 : vector<16x128xf32> to vector<2x8x128xf32>
    %cst_13 = arith.constant dense<0.000000e+00> : vector<8x128xf32>
    %34 = vector.multi_reduction <add>, %33, %cst_13 [0] : vector<2x8x128xf32> to vector<8x128xf32>
    %35 = arith.addf %5, %34 : vector<8x128xf32>
    %36 = vector.shape_cast %25 : vector<16x128xf32> to vector<2x8x128xf32>
    %cst_14 = arith.constant dense<0.000000e+00> : vector<8x128xf32>
    %37 = vector.multi_reduction <add>, %36, %cst_14 [0] : vector<2x8x128xf32> to vector<8x128xf32>
    %38 = arith.addf %6, %37 : vector<8x128xf32>
    %c1_i32 = arith.constant 1 : i32
    %c0_15 = arith.constant 0 : index
    %c0_16 = arith.constant 0 : index
    %c0_17 = arith.constant 0 : index
    %39 = vector.load %arg4[%c0_15, %c0_16, %c0_17] : memref<1x32x128xf32, #tpu.memory_space<vmem>>, vector<1x8x128xf32>
    %40 = vector.shape_cast %39 : vector<1x8x128xf32> to vector<8x128xf32>
    %41 = arith.addf %40, %29 : vector<8x128xf32>
    %c0_18 = arith.constant 0 : index
    %c0_19 = arith.constant 0 : index
    %c0_20 = arith.constant 0 : index
    %42 = vector.load %arg4[%c0_18, %c0_19, %c0_20] : memref<1x32x128xf32, #tpu.memory_space<vmem>>, vector<1x8x128xf32>
    %43 = vector.shape_cast %42 : vector<1x8x128xf32> to vector<8x128xf32>
    %44 = vector.shape_cast %41 : vector<8x128xf32> to vector<1x8x128xf32>
    tpu.vector_store %arg4[%c0_18, %c0_19, %c0_20], %44 {strides = array<i32>} : memref<1x32x128xf32, #tpu.memory_space<vmem>>, vector<1x8x128xf32>,
    %c0_21 = arith.constant 0 : index
    %c8 = arith.constant 8 : index
    %c0_22 = arith.constant 0 : index
    %45 = vector.load %arg4[%c0_21, %c8, %c0_22] : memref<1x32x128xf32, #tpu.memory_space<vmem>>, vector<1x8x128xf32>
    %46 = vector.shape_cast %45 : vector<1x8x128xf32> to vector<8x128xf32>
    %47 = arith.addf %46, %32 : vector<8x128xf32>
    %c0_23 = arith.constant 0 : index
    %c8_24 = arith.constant 8 : index
    %c0_25 = arith.constant 0 : index
    %48 = vector.load %arg4[%c0_23, %c8_24, %c0_25] : memref<1x32x128xf32, #tpu.memory_space<vmem>>, vector<1x8x128xf32>
    %49 = vector.shape_cast %48 : vector<1x8x128xf32> to vector<8x128xf32>
    %50 = vector.shape_cast %47 : vector<8x128xf32> to vector<1x8x128xf32>
    tpu.vector_store %arg4[%c0_23, %c8_24, %c0_25], %50 {strides = array<i32>} : memref<1x32x128xf32, #tpu.memory_space<vmem>>, vector<1x8x128xf32>,
    %c0_26 = arith.constant 0 : index
    %c16 = arith.constant 16 : index
    %c0_27 = arith.constant 0 : index
    %51 = vector.load %arg4[%c0_26, %c16, %c0_27] : memref<1x32x128xf32, #tpu.memory_space<vmem>>, vector<1x8x128xf32>
    %52 = vector.shape_cast %51 : vector<1x8x128xf32> to vector<8x128xf32>
    %53 = arith.addf %52, %35 : vector<8x128xf32>
    %c0_28 = arith.constant 0 : index
    %c16_29 = arith.constant 16 : index
    %c0_30 = arith.constant 0 : index
    %54 = vector.load %arg4[%c0_28, %c16_29, %c0_30] : memref<1x32x128xf32, #tpu.memory_space<vmem>>, vector<1x8x128xf32>
    %55 = vector.shape_cast %54 : vector<1x8x128xf32> to vector<8x128xf32>
    %56 = vector.shape_cast %53 : vector<8x128xf32> to vector<1x8x128xf32>
    tpu.vector_store %arg4[%c0_28, %c16_29, %c0_30], %56 {strides = array<i32>} : memref<1x32x128xf32, #tpu.memory_space<vmem>>, vector<1x8x128xf32>,
    %c0_31 = arith.constant 0 : index
    %c24 = arith.constant 24 : index
    %c0_32 = arith.constant 0 : index
    %57 = vector.load %arg4[%c0_31, %c24, %c0_32] : memref<1x32x128xf32, #tpu.memory_space<vmem>>, vector<1x8x128xf32>
    %58 = vector.shape_cast %57 : vector<1x8x128xf32> to vector<8x128xf32>
    %59 = arith.addf %58, %38 : vector<8x128xf32>
    %c0_33 = arith.constant 0 : index
    %c24_34 = arith.constant 24 : index
    %c0_35 = arith.constant 0 : index
    %60 = vector.load %arg4[%c0_33, %c24_34, %c0_35] : memref<1x32x128xf32, #tpu.memory_space<vmem>>, vector<1x8x128xf32>
    %61 = vector.shape_cast %60 : vector<1x8x128xf32> to vector<8x128xf32>
    %62 = vector.shape_cast %59 : vector<8x128xf32> to vector<1x8x128xf32>
    tpu.vector_store %arg4[%c0_33, %c24_34, %c0_35], %62 {strides = array<i32>} : memref<1x32x128xf32, #tpu.memory_space<vmem>>, vector<1x8x128xf32>,
    return
  }
  func.func @transform_0(%arg0: i32, %arg1: i32) -> (i32, i32, i32) {
    %c0_i32 = arith.constant 0 : i32
    %c0_i32_0 = arith.constant 0 : i32
    return %arg0, %arg1, %c0_i32 : i32, i32, i32
  }
  func.func @transform_1(%arg0: i32, %arg1: i32) -> (i32, i32, i32) {
    %c0_i32 = arith.constant 0 : i32
    %c0_i32_0 = arith.constant 0 : i32
    return %arg0, %arg1, %c0_i32 : i32, i32, i32
  }
  func.func @transform_2(%arg0: i32, %arg1: i32) -> (i32, i32, i32) {
    %c0_i32 = arith.constant 0 : i32
    %c0_i32_0 = arith.constant 0 : i32
    %c0_i32_1 = arith.constant 0 : i32
    return %arg0, %c0_i32, %c0_i32_0 : i32, i32, i32
  }
}

</mosaic_0001>

<bundles_post_ra>
// kernel: tpu_custom_call.1
= control target key start
LH: loop header
LB: loop body
LE: loop exit
PB: predicated region body
PF: predicated region fallthrough
CT: control target
= control target key end

     0   :  { %7 = vsyncpa [#allocation3], 0  ;;  %s263_s0 = inlined_call_operand.hbm [shape: f32[1,16,128], index: 0, kind: input, shape index: {}]   ;;  %s264_s1 = inlined_call_operand.hbm [shape: f32[1,16,128], index: 1, kind: input, shape index: {}]   ;;  %s265_s2 = inlined_call_operand.hbm [shape: f32[1,32,128], index: 2, kind: output, shape index: {}]  }
   0x1   :  { %8 = vsyncpa [#allocation6], 0 }
   0x2   :  { %9 = vsyncpa [#allocation4], 0  ;;  %s198_s9 = smov [#allocation2]   ;;  %s126_s13 = scalar_lea.hbm %s263_s0, 256 }
   0x3   :  { %s15_s10 = sshll.u32 %s198_s9, 4  ;;  %p127_p0 = scmp.ne.s32.totalorder %s263_s0, %s126_s13  ;;  %s16_s10 = int_to_ptr.vmem [resolvable:$true] %s15_s10 }
   0x4   :  { %p130_p1 = scmp.lt.u32.totalorder %s126_s13, %s263_s0 }
   0x6   :  { %p132_p2 = pnand %p130_p1, %p127_p0 }
   0x8   :  { %135 = shalt.err (!%p132_p2)
}
   0x9   :  { %s136_s18 = scalar_lea.vmem %s16_s10, 256  ;;  %p141_p4 = scmp.lt.s32.totalorder %s16_s10, %s16_s10 }
   0xa   :  { %p137_p3 = scmp.ne.s32.totalorder %s16_s10, %s136_s18  ;;  %p142_p5 = scmp.lt.s32.totalorder %s136_s18, %s136_s18 }
   0xc   :  { %p143_p6 = por %p142_p5, %p141_p4 }
   0xe   :  { %p144_p7 = pnand %p143_p6, %p137_p3 }
  0x10   :  { %147 = shalt.err (!%p144_p7)
}
  0x11   :  { %s199_s19 = smov 128   ;;  %s200_s20 = smov 8  }
  0x12   :  { %21 = dma.hbm_to_vmem [thread:$0]  %s263_s0, 256, %s16_s10, [#allocation3], %s199_s19, %s199_s19, %s200_s20  }
  0x13   :  { %s201_s23 = smov [#allocation5]   ;;  %s148_s27 = scalar_lea.hbm %s264_s1, 256 }
  0x14   :  { %s27_s24 = sshll.u32 %s201_s23, 4  ;;  %p149_p8 = scmp.ne.s32.totalorder %s264_s1, %s148_s27  ;;  %s28_s24 = int_to_ptr.vmem [resolvable:$true] %s27_s24 }
  0x15   :  { %p152_p9 = scmp.lt.u32.totalorder %s148_s27, %s264_s1 }
  0x17   :  { %p154_p10 = pnand %p152_p9, %p149_p8 }
  0x19   :  { %157 = shalt.err (!%p154_p10)
}
  0x1a   :  { %s158_s4 = scalar_lea.vmem %s28_s24, 256  ;;  %p163_p12 = scmp.lt.s32.totalorder %s28_s24, %s28_s24 }
  0x1b   :  { %p159_p11 = scmp.ne.s32.totalorder %s28_s24, %s158_s4  ;;  %p164_p13 = scmp.lt.s32.totalorder %s158_s4, %s158_s4 }
  0x1d   :  { %p165_p0 = por %p164_p13, %p163_p12 }
  0x1f   :  { %p166_p1 = pnand %p165_p0, %p159_p11 }
  0x21   :  { %169 = shalt.err (!%p166_p1)
}
  0x22   :  { %33 = dma.hbm_to_vmem [thread:$0]  %s264_s1, 256, %s28_s24, [#allocation6], %s199_s19, %s199_s19, %s200_s20  }
  0x23   :  { %192 = dma.done.wait [#allocation3], 256  }
  0x24   :  { %193 = vsyncadd [#allocation3], 4294967040 }
  0x25   :  { %194 = dma.done.wait [#allocation6], 256  }
  0x26   :  { %195 = vsyncadd [#allocation6], 4294967040  ;;  %v48_v0 = vld [vmem:[#allocation2] sm:$0xff]  ;;  %v49_v1 = vld [vmem:[#allocation2 + $0x8] sm:$0xff]  ;;  %s202_s1 = smov [#allocation7]  }
  0x27   :  { %v50_v2 = vld [vmem:[#allocation5] sm:$0xff]  ;;  %v51_v3 = vld [vmem:[#allocation5 + $0x8] sm:$0xff]  ;;  %118 = vlog2.f32 %v48_v0  ;;  %v76_v5 = vadd.f32 %v49_v1, %v48_v0  ;;  %v58_v6 = vsub.f32 1.0, %v48_v0  ;;  %v59_v9 = vsub.f32 1.0, %v49_v1  ;;  %s99_s6 = sshll.u32 %s202_s1, 4  ;;  %s100_s6 = int_to_ptr.vmem [resolvable:$true] %s99_s6 }
  0x28   :  { %v72_v4 = vmul.f32 %v50_v2, %v48_v0  ;;  %120 = vlog2.f32 %v49_v1  ;;  %v73_v7 = vmul.f32 %v51_v3, %v49_v1  ;;  %v78_v8 = vadd.f32 %v51_v3, %v50_v2  ;;  %s170_s7 = scalar_lea.vmem %s100_s6, 512  ;;  %p175_p3 = scmp.lt.s32.totalorder %s100_s6, %s100_s6 }
  0x29   :  { %122 = vlog2.f32 %v58_v6  ;;  %87 = vst [vmem:[#allocation7 + $0x8] sm:$0xff] %v76_v5  ;;  %p171_p2 = scmp.ne.s32.totalorder %s100_s6, %s170_s7  ;;  %p176_p4 = scmp.lt.s32.totalorder %s170_s7, %s170_s7 }
  0x2a   :  { %v74_v10 = vadd.f32 %v73_v7, %v72_v4  ;;  %124 = vlog2.f32 %v59_v9  ;;  %90 = vst [vmem:[#allocation7 + $0x10] sm:$0xff] %v78_v8 }
  0x2b   :  { %p177_p5 = por %p176_p4, %p175_p3 }
  0x2c   :  { %84 = vst [vmem:[#allocation7] sm:$0xff] %v74_v10 }
  0x2d   :  { %p178_p6 = pnand %p177_p5, %p171_p2 }
  0x31   :  { %v119_v11 = vpop.eup %118 }
  0x32   :  { %v121_v12 = vpop.eup %120  ;;  %v53_v13 = vmul.f32 0.6931472, %v119_v11 }
  0x33   :  { %v123_v14 = vpop.eup %122  ;;  %v55_v15 = vmul.f32 0.6931472, %v121_v12 }
  0x34   :  { %v125_v16 = vpop.eup %124  ;;  %v56_v17 = vmax.f32 %v53_v13, -100.0  ;;  %v61_v18 = vmul.f32 0.6931472, %v123_v14 }
  0x35   :  { %v57_v19 = vmax.f32 %v55_v15, -100.0  ;;  %v63_v20 = vmul.f32 0.6931472, %v125_v16 }
  0x36   :  { %v64_v21 = vmax.f32 %v61_v18, -100.0 }
  0x37   :  { %v65_v22 = vmax.f32 %v63_v20, -100.0 }
  0x38   :  { %v66_v23 = vsub.f32 %v56_v17, %v64_v21 }
  0x39   :  { %v67_v24 = vsub.f32 %v57_v19, %v65_v22 }
  0x3a   :  { %v68_v25 = vmul.f32 %v66_v23, %v50_v2 }
  0x3b   :  { %v69_v26 = vmul.f32 %v67_v24, %v51_v3 }
  0x3c   :  { %v70_v27 = vadd.f32 %v68_v25, %v64_v21 }
  0x3d   :  { %v71_v28 = vadd.f32 %v69_v26, %v65_v22 }
  0x3f   :  { %v80_v29 = vadd.f32 %v71_v28, %v70_v27 }
  0x41   :  { %93 = vst [vmem:[#allocation7 + $0x18] sm:$0xff] %v80_v29 }
  0x42   :  { %181 = shalt.err (!%p178_p6)
}
  0x43   :  { %s182_s10 = scalar_lea.hbm %s265_s2, 512 }
  0x44   :  { %p183_p7 = scmp.ne.s32.totalorder %s265_s2, %s182_s10  ;;  %p186_p8 = scmp.lt.u32.totalorder %s182_s10, %s265_s2 }
  0x46   :  { %p188_p9 = pnand %p186_p8, %p183_p7 }
  0x48   :  { %191 = shalt.err (!%p188_p9)
}
  0x49   :  { %105 = dma.vmem_to_hbm [thread:$0]  %s100_s6, 512, %s265_s2, [#allocation4], %s199_s19, %s199_s19, %s200_s20  }
  0x4a   :  { %196 = dma.done.wait [#allocation4], 512  }
  0x4b   :  { %197 = vsyncadd [#allocation4], 4294966784 }
  0x4c   :  { %109 = vsyncpa [#allocation3], 1 }
  0x4d   :  { %110 = vsyncpa [#allocation6], 1 }
  0x4e   :  { %111 = vsyncpa [#allocation4], 1 }

</bundles_post_ra>
